<compile_context>
chip_gen: v6e
topology: v6e:2x2x1
jax: 0.10.0
libtpu: 0.0.40
codegen_flags: <defaults>
</compile_context>

<pallas_src>
import math

import jax
import jax.numpy as jnp
from jax.experimental import pallas as pl
from jax.experimental.pallas import tpu as pltpu


def _xavier_uniform(key, fan_in, fan_out, dtype=jnp.float32):
    # matches torch.nn.init.xavier_uniform_ (gain=1.0)
    bound = math.sqrt(6.0 / (fan_in + fan_out))
    return jax.random.uniform(key, (fan_in, fan_out), dtype=dtype,
                              minval=-bound, maxval=bound)


def mlp_kernel(x_ref, w1_ref, b1_ref, w2_ref, b2_ref, o_ref):
    # Layer 1 on the MXU; bias add is a single VPU op hidden under the MXU/DMA.
    h = jnp.dot(x_ref[...], w1_ref[...], preferred_element_type=jnp.float32)
    h = jnp.maximum(h + b1_ref[...], 0.0)                       # (tm, d_hid)
    # Layer 2 (out_features == 1): contract w2_row (1, d_hid) with h (tm, d_hid) on their
    # last dims (same pattern as attention q@k^T) -> lane-dense (1, tm) row instead of a
    # (tm, 1) masked-store column.
    o_row = jax.lax.dot_general(
        w2_ref[...], h,
        dimension_numbers=(((1,), (1,)), ((), ())),
        preferred_element_type=jnp.float32)                     # (1, tm)
    # b2 rides the scalar path (1-D SMEM operand).
    o_ref[0] = o_row + b2_ref[0]


def _pick_tm(B):
    # Big tiles amortize the ~0.35 us per-grid-step overhead; an x tile at tm=16384 is
    # only ~0.64 MB f32 (double-buffered < 2 MB), trivial on every generation.
    cap = 16384
    if B > cap:
        return cap
    if B >= 256:
        return pl.cdiv(B, 2)      # keep >=2 grid steps so both v7x TCs get work
    return B


def mlp_forward(x, w1, b1, w2, b2, *, tm=None):
    """relu(x @ w1 + b1) @ w2 + b2 with x:(B,10) w1:(10,20) b1:(20,) w2:(20,1) b2:(1,)."""
    B, d_in = x.shape
    d_hid = w1.shape[1]

    x = x.astype(jnp.float32)
    w1 = jnp.asarray(w1, jnp.float32)
    b1_row = jnp.asarray(b1, jnp.float32).reshape(1, d_hid)     # resident VMEM bias
    w2_row = jnp.asarray(w2, jnp.float32).reshape(1, d_hid)     # (20,1)->(1,20), contiguous
    b2_s = jnp.asarray(b2, jnp.float32).reshape(1)              # 1-D SMEM scalar

    if tm is None:
        tm = _pick_tm(B)
    tm = max(8, ((int(tm) + 7) // 8) * 8)                       # sublane multiple
    n_tiles = pl.cdiv(B, tm)

    out = pl.pallas_call(
        mlp_kernel,
        out_shape=jax.ShapeDtypeStruct((n_tiles, 1, tm), jnp.float32),
        grid=(n_tiles,),
        in_specs=[
            pl.BlockSpec((tm, d_in), lambda i: (i, 0)),          # x streams over batch
            pl.BlockSpec((d_in, d_hid), lambda i: (0, 0)),       # resident w1
            pl.BlockSpec((1, d_hid), lambda i: (0, 0)),          # resident b1
            pl.BlockSpec((1, d_hid), lambda i: (0, 0)),          # resident w2 row
            pl.BlockSpec((1,), lambda i: (0,),
                         memory_space=pltpu.MemorySpace.SMEM),   # scalar b2
        ],
        out_specs=pl.BlockSpec((1, 1, tm), lambda i: (i, 0, 0)),  # lane-dense rows
        compiler_params=pltpu.CompilerParams(
            dimension_semantics=("parallel",)),                  # shards over 2 TCs on v7x
    )(x, w1, b1_row, w2_row, b2_s)

    # (n_tiles, 1, tm) -> (B, 1).  Any rows past B in a partial last tile were computed on
    # out-of-bounds garbage (per-row only, no cross-batch reduction) and are dropped here.
    return out.reshape(n_tiles * tm, 1)[:B]


if __name__ == "__main__":
    key = jax.random.PRNGKey(0)
    k_x, k_w1, k_w2, k_b1, k_b2 = jax.random.split(key, 5)

    B, D_IN, D_HID, D_OUT = 256, 10, 20, 1

    # Deterministic parameter init mirroring MyModel._init_weights:
    # xavier_uniform on weights, zeros on biases.
    w1 = _xavier_uniform(k_w1, D_IN, D_HID)          # (10, 20)
    b1 = jnp.zeros((D_HID,), dtype=jnp.float32)      # (20,)
    w2 = _xavier_uniform(k_w2, D_HID, D_OUT)         # (20, 1)
    b2 = jnp.zeros((D_OUT,), dtype=jnp.float32)      # (1,)

    x = jax.random.normal(k_x, (B, D_IN), dtype=jnp.float32)

    # Auto tm -> 128, 2-step batch grid with resident weights.
    out = jax.block_until_ready(mlp_forward(x, w1, b1, w2, b2))
    ref = jnp.maximum(x @ w1 + b1, 0.0) @ w2 + b2
    assert out.shape == (B, D_OUT)
    assert jnp.allclose(out, ref, atol=1e-5, rtol=1e-5)

    # Extra check with non-zero biases and a 4-step grid to exercise the in-kernel bias
    # paths and a different tile size.
    b1_nz = jax.random.normal(k_b1, (D_HID,), dtype=jnp.float32)
    b2_nz = jax.random.normal(k_b2, (D_OUT,), dtype=jnp.float32)
    out_nz = jax.block_until_ready(mlp_forward(x, w1, b1_nz, w2, b2_nz, tm=64))
    ref_nz = jnp.maximum(x @ w1 + b1_nz, 0.0) @ w2 + b2_nz
    assert jnp.allclose(out_nz, ref_nz, atol=1e-5, rtol=1e-5)

    print("KERNEL_OK")
</pallas_src>

<mosaic_0001>
module attributes {stable_mosaic.version = 11 : i64} {
  func.func @mlp_kernel(%arg0: i32, %arg1: memref<128x10xf32, #tpu.memory_space<vmem>>, %arg2: memref<10x20xf32, #tpu.memory_space<vmem>>, %arg3: memref<1x20xf32, #tpu.memory_space<vmem>>, %arg4: memref<1x20xf32, #tpu.memory_space<vmem>>, %arg5: memref<1xf32, #tpu.memory_space<smem>>, %arg6: memref<1x1x128xf32, #tpu.memory_space<vmem>>) attributes {dimension_semantics = [#tpu.dimension_semantics<parallel>], iteration_bounds = array<i64: 2>, scalar_prefetch = 0 : i64, scratch_operands = 0 : i64, tpu.core_type = #tpu.core_type<tc>, window_params = [{transform_indices = @transform_0, window_bounds = array<i64: 128, 10>}, {pipeline_mode = #tpu.pipeline_mode<synchronous>, transform_indices = @transform_1, window_bounds = array<i64: 10, 20>}, {pipeline_mode = #tpu.pipeline_mode<synchronous>, transform_indices = @transform_2, window_bounds = array<i64: 1, 20>}, {pipeline_mode = #tpu.pipeline_mode<synchronous>, transform_indices = @transform_3, window_bounds = array<i64: 1, 20>}, {transform_indices = @transform_4, window_bounds = array<i64: 1>}, {transform_indices = @transform_5, window_bounds = array<i64: 1, 1, 128>}]} {
    %c0 = arith.constant 0 : index
    %c0_0 = arith.constant 0 : index
    %0 = vector.load %arg1[%c0, %c0_0] : memref<128x10xf32, #tpu.memory_space<vmem>>, vector<128x10xf32>
    %c0_1 = arith.constant 0 : index
    %c0_2 = arith.constant 0 : index
    %1 = vector.load %arg2[%c0_1, %c0_2] : memref<10x20xf32, #tpu.memory_space<vmem>>, vector<10x20xf32>
    %cst = arith.constant dense<0.000000e+00> : vector<128x20xf32>
    %2 = tpu.matmul %0, %1, %cst {dimension_numbers = #tpu.dot_dimension_numbers<[1], [0], [0], [1], [0, 0, 1, 1], [], []>} : vector<128x10xf32>, vector<10x20xf32>, vector<128x20xf32> -> vector<128x20xf32>
    %c0_3 = arith.constant 0 : index
    %c0_4 = arith.constant 0 : index
    %3 = vector.load %arg3[%c0_3, %c0_4] : memref<1x20xf32, #tpu.memory_space<vmem>>, vector<1x20xf32>
    %4 = vector.broadcast %3 : vector<1x20xf32> to vector<128x20xf32>
    %5 = arith.addf %2, %4 : vector<128x20xf32>
    %cst_5 = arith.constant 0.000000e+00 : f32
    %6 = vector.broadcast %cst_5 : f32 to vector<128x20xf32>
    %7 = arith.maximumf %5, %6 : vector<128x20xf32>
    %c0_6 = arith.constant 0 : index
    %c0_7 = arith.constant 0 : index
    %8 = vector.load %arg4[%c0_6, %c0_7] : memref<1x20xf32, #tpu.memory_space<vmem>>, vector<1x20xf32>
    %cst_8 = arith.constant dense<0.000000e+00> : vector<1x128xf32>
    %9 = tpu.matmul %8, %7, %cst_8 {dimension_numbers = #tpu.dot_dimension_numbers<[1], [1], [0], [0], [0, 0, 1, 0], [], []>} : vector<1x20xf32>, vector<128x20xf32>, vector<1x128xf32> -> vector<1x128xf32>
    %c0_9 = arith.constant 0 : index
    %10 = memref.load %arg5[%c0_9] : memref<1xf32, #tpu.memory_space<smem>>
    %11 = vector.broadcast %10 : f32 to vector<1x128xf32>
    %12 = arith.addf %9, %11 : vector<1x128xf32>
    %c0_10 = arith.constant 0 : index
    %c0_11 = arith.constant 0 : index
    %c0_12 = arith.constant 0 : index
    %13 = vector.load %arg6[%c0_10, %c0_11, %c0_12] : memref<1x1x128xf32, #tpu.memory_space<vmem>>, vector<1x1x128xf32>
    %14 = vector.shape_cast %13 : vector<1x1x128xf32> to vector<1x128xf32>
    %15 = vector.shape_cast %12 : vector<1x128xf32> to vector<1x1x128xf32>
    tpu.vector_store %arg6[%c0_10, %c0_11, %c0_12], %15 {strides = array<i32>} : memref<1x1x128xf32, #tpu.memory_space<vmem>>, vector<1x1x128xf32>,
    return
  }
  func.func @transform_0(%arg0: i32) -> (i32, i32) {
    %c0_i32 = arith.constant 0 : i32
    %c0_i32_0 = arith.constant 0 : i32
    return %arg0, %c0_i32 : i32, i32
  }
  func.func @transform_1(%arg0: i32) -> (i32, i32) {
    %c0_i32 = arith.constant 0 : i32
    %c0_i32_0 = arith.constant 0 : i32
    %c0_i32_1 = arith.constant 0 : i32
    return %c0_i32, %c0_i32_0 : i32, i32
  }
  func.func @transform_2(%arg0: i32) -> (i32, i32) {
    %c0_i32 = arith.constant 0 : i32
    %c0_i32_0 = arith.constant 0 : i32
    %c0_i32_1 = arith.constant 0 : i32
    return %c0_i32, %c0_i32_0 : i32, i32
  }
  func.func @transform_3(%arg0: i32) -> (i32, i32) {
    %c0_i32 = arith.constant 0 : i32
    %c0_i32_0 = arith.constant 0 : i32
    %c0_i32_1 = arith.constant 0 : i32
    return %c0_i32, %c0_i32_0 : i32, i32
  }
  func.func @transform_4(%arg0: i32) -> i32 {
    %c0_i32 = arith.constant 0 : i32
    %c0_i32_0 = arith.constant 0 : i32
    return %c0_i32 : i32
  }
  func.func @transform_5(%arg0: i32) -> (i32, i32, i32) {
    %c0_i32 = arith.constant 0 : i32
    %c0_i32_0 = arith.constant 0 : i32
    %c0_i32_1 = arith.constant 0 : i32
    return %arg0, %c0_i32, %c0_i32_0 : i32, i32, i32
  }
}

</mosaic_0001>

<bundles_post_ra>
// kernel: tpu_custom_call.1
= control target key start
LH: loop header
LB: loop body
LE: loop exit
PB: predicated region body
PF: predicated region fallthrough
CT: control target
= control target key end

     0   :  { %s1120_s0 = inlined_call_operand.vmem [shape: f32[256,10], index: 0, kind: input, shape index: {}]   ;;  %s1121_s1 = inlined_call_operand.vmem [shape: f32[10,20], index: 1, kind: input, shape index: {}]   ;;  %s1122_s2 = inlined_call_operand.vmem [shape: f32[1,20], index: 2, kind: input, shape index: {}]   ;;  %s1123_s3 = inlined_call_operand.vmem [shape: f32[1,20], index: 3, kind: input, shape index: {}]   ;;  %s1124_s4 = inlined_call_operand.<no memory space> [shape: f32[1], index: 4, kind: input, shape index: {}]   ;;  %s1125_s5 = inlined_call_operand.hbm [shape: f32[2,1,128], index: 5, kind: output, shape index: {}]  }
   0x1   :  { %10 = sst [smem:[#allocation2]] %s1124_s4 }
   0x2   :  { %11 = vsyncpa [#allocation4], 0 }
   0x3   :  { %13 = vsyncpa [#allocation4 + $0x1], 0  ;;  %s939_s20 = smov 0   ;;  %s941_s21 = smov 0  }
   0x4   :  { %s943_s22 = smov 0   ;;  %s945_s23 = smov 0  }
   0x5 LB: > { %s657_s4 = sadd.s32 4294967295, %s901_s23   ;;  %s658_s24 = sadd.s32 4294967294, %s901_s23   ;;  %s901_s23 = sphi %s945_s23, %s1131_s23   ;;  %s897_s22 = sphi %s943_s22, %s1130_s22   ;;  %s893_s21 = sphi %s941_s21, %s1129_s21   ;;  %s889_s20 = sphi %s939_s20, %s1128_s20  }
   0x6   : > { %s962_s25 = sadd.s32 1, %s901_s23   ;;  %s136_s26 = sadd.s32 1, %s897_s22 }
   0x7   : > { %s133_s27 = ssub.s32 %s901_s23, %s962_s25  ;;  %p146_p0 = scmp.ne.s32.totalorder %s897_s22, %s893_s21 }
   0x8   : > { %p134_p1 = scmp.eq.s32.totalorder %s133_s27, 0  ;;  %p147_p2 = scmp.eq.s32.totalorder %s657_s4, 1 }
   0x9   : > { %p152_p3 = scmp.ne.s32.totalorder %s893_s21, %s889_s20  ;;  %p153_p4 = scmp.eq.s32.totalorder %s658_s24, 1 }
   0xa   : > { %s972_s28 = scalar_select %p134_p1, %s897_s22, %s136_s26  }
   0xb   : > { %p974_p5 = por %p147_p2, %p146_p0  ;;  %p978_p6 = por %p153_p4, %p152_p3 }
   0xc   : > { %p661_p7 = scmp.ge.s32.totalorder %s901_s23, 1  ;;  %p192_p8 = scmp.lt.s32.totalorder %s901_s23, 3 }
   0xe   : > { %p193_p9 = pnand %p661_p7, %p192_p8 }
   0xf   : > { %s990_s10 = sshll.u32 (!%p193_p9), %s657_s4, 4  ;;  %s465_s4 = sld [smem:[#allocation2]] (!%p193_p9) }
  0x10   : > { %196 = sbr.rel (%p193_p9) target bundleno = 523 (0x20b), region = 40  ;;  %p220_p10 = scmp.lt.s32.totalorder (!%p193_p9), %s990_s10, 31 }
  0x11   : > { %s217_s24 = sand.u32 (!%p193_p9), 1, %s893_s21   ;;  %s1085_s8 = scalar_lea.hbm (!%p193_p9), %s1125_s5, %s990_s10 }
  0x12   : > { %s218_s26 = scalar_lea.vmem (!%p193_p9), [#allocation3], %s217_s24  ;;  %s591_s9 = scalar_lea.sflag (!%p193_p9), [#allocation4], %s217_s24 }
  0x13   : > { %s603_s27 = sshll.u32 (!%p193_p9), %s218_s26, 4  ;;  %s604_s27 = int_to_ptr.vmem [resolvable:$true] %s603_s27 }
  0x15   : > { %v242_v0 = vld [vmem:[%s1121_s1 + $0x8] sm:$0x3]  ;;  %vm299_vm0 = vcmask 1041408   ;;  %v241_v1 = vld [vmem:[%s1121_s1] sm:$0xff]  ;;  %s221_s11 = scalar_select %p220_p10, %s990_s10, 31  ;;  %vm250_vm1 = vcmask 80896  }
  0x16   : > { %737 = vmatprep.subr.msk.mxu0 %vm299_vm0, %v242_v0  ;;  %v903_v18 = vmov 0.0   ;;  %vm904_vm2 = vmmov 0   ;;  %v664_v33 = vld [vmem:[%s1122_s2] ss:$0 sm:$0xff]  ;;  %vm467_vm3 = vcmask 162816  }
  0x17   : > { %738 = vmatpush3.msk.msra.mxu0 %vm299_vm0, %v242_v0  ;;  %s663_s12 = sshll.u32 %s221_s11, 3  ;;  %765 = vmatprep.subr.mxu1 %v903_v18  ;;  %s841_s11 = scalar_lea.vmem %s604_s27, 16 }
  0x18   : > { %739 = vmatprep.subr.mxu0 %v241_v1  ;;  %s997_s15 = scalar_lea.vmem %s1120_s0, %s663_s12  ;;  %797 = vmatprep.mubr.msk.f32.mxu1 %vm904_vm2, %v903_v18  ;;  %p842_p11 = scmp.ne.s32.totalorder %s604_s27, %s841_s11 }
  0x19   : > { %740 = vmatpush3.msra.mxu0 %v241_v1  ;;  %v225_v2 = vld [vmem:[%s997_s15] sm:$0xff]  ;;  %v226_v3 = vld [vmem:[%s997_s15 + $0x8] sm:$0xff]  ;;  %v227_v4 = vld [vmem:[%s997_s15 + $0x10] sm:$0xff]  ;;  %s905_s12 = smov [#allocation3]  }
  0x1a   : > { %741 = vmatprep.mubr.msk.f32.mxu0 %vm250_vm1, %v225_v2  ;;  %v228_v5 = vld [vmem:[%s997_s15 + $0x18] sm:$0xff]  ;;  %v229_v6 = vld [vmem:[%s997_s15 + $0x20] sm:$0xff]  ;;  %v230_v7 = vld [vmem:[%s997_s15 + $0x28] sm:$0xff]  ;;  %p843_p12 = pnand %p842_p11, %p974_p5  ;;  %s845_s13 = sshll.u32 %s905_s12, 4  ;;  %s846_s13 = int_to_ptr.vmem [resolvable:$false] %s845_s13 }
  0x1b   : > { %742 = vmatmul.mubr.msk.f32.vlgmr.msra.gmra.mxu0 %vm250_vm1, %v226_v3  ;;  %v231_v8 = vld [vmem:[%s997_s15 + $0x30] sm:$0xff]  ;;  %v232_v9 = vld [vmem:[%s997_s15 + $0x38] sm:$0xff]  ;;  %v233_v10 = vld [vmem:[%s997_s15 + $0x40] sm:$0xff]  ;;  %s847_s14 = scalar_lea.vmem %s846_s13, 32  ;;  %p848_p0 = scmp.lt.s32.totalorder %s604_s27, %s846_s13 }
  0x1c   : > { %744 = vmatprep.mubr.msk.f32.mxu0 %vm250_vm1, %v227_v4  ;;  %v234_v11 = vld [vmem:[%s997_s15 + $0x48] sm:$0xff]  ;;  %v235_v12 = vld [vmem:[%s997_s15 + $0x50] sm:$0xff]  ;;  %v236_v13 = vld [vmem:[%s997_s15 + $0x58] sm:$0xff]  ;;  %p844_p13 = pneg %p843_p12  ;;  %p849_p1 = scmp.lt.s32.totalorder %s847_s14, %s841_s11 }
  0x1d   : > { %v237_v14 = vld [vmem:[%s997_s15 + $0x60] sm:$0xff]  ;;  %v238_v15 = vld [vmem:[%s997_s15 + $0x68] sm:$0xff]  ;;  %v239_v16 = vld [vmem:[%s997_s15 + $0x70] sm:$0xff] }
  0x1e   : > { %v240_v17 = vld [vmem:[%s997_s15 + $0x78] sm:$0xff]  ;;  %v464_v4 = vld [vmem:[%s1123_s3] sm:$0x1]  ;;  %p850_p2 = por %p849_p1, %p848_p0 }
  0x1f   : > { %745 = vmatmul.mubr.msk.f32.gmra.mxu0 %vm250_vm1, %v228_v5  ;;  %v466_v5 = vstv %s465_s4 }
  0x20   : > { %747 = vmatprep.mubr.msk.f32.mxu0 %vm250_vm1, %v229_v6  ;;  %p851_p3 = pnand %p850_p2, %p844_p13 }
  0x23   : > { %748 = vmatmul.mubr.msk.f32.gmra.mxu0 %vm250_vm1, %v230_v7 }
  0x24   : > { %750 = vmatprep.mubr.msk.f32.mxu0 %vm250_vm1, %v231_v8 }
  0x27   : > { %751 = vmatmul.mubr.msk.f32.gmra.mxu0 %vm250_vm1, %v232_v9 }
  0x28   : > { %753 = vmatprep.mubr.msk.f32.mxu0 %vm250_vm1, %v233_v10 }
  0x2b   : > { %754 = vmatmul.mubr.msk.f32.gmra.mxu0 %vm250_vm1, %v234_v11 }
  0x2c   : > { %756 = vmatprep.mubr.msk.f32.mxu0 %vm250_vm1, %v235_v12 }
  0x2f   : > { %757 = vmatmul.mubr.msk.f32.gmra.mxu0 %vm250_vm1, %v236_v13 }
  0x30   : > { %759 = vmatprep.mubr.msk.f32.mxu0 %vm250_vm1, %v237_v14 }
  0x33   : > { %760 = vmatmul.mubr.msk.f32.gmra.mxu0 %vm250_vm1, %v238_v15 }
  0x34   : > { %762 = vmatprep.mubr.msk.f32.mxu0 %vm250_vm1, %v239_v16 }
  0x37   : > { %763 = vmatmul.mubr.msk.f32.gmra.mxu0 %vm250_vm1, %v240_v17 }
  0xdb   : > { %v1033_v19 = vpop.f32.mrf.mxu0 }
  0xdc   : > { %v375_v63 = vadd.f32 %v1033_v19, %v664_v33 }
  0xdd   : > { %v1035_v20 = vpop.f32.mrf.mxu0 }
  0xde   : > { %v449_v1 = vmax.f32 %v375_v63, 0.0  ;;  %v370_v2 = vadd.f32 %v664_v33, %v1035_v20 }
  0xdf   : > { %v746_v21 = vpop.f32.mrf.mxu0 }
  0xe0   : > { %v385_v59 = vadd.f32 %v746_v21, %v664_v33  ;;  %v448_v3 = vmax.f32 %v370_v2, 0.0 }
  0xe1   : > { %v1037_v22 = vpop.f32.mrf.mxu0 }
  0xe2   : > { %v451_v61 = vmax.f32 %v385_v59, 0.0  ;;  %v380_v62 = vadd.f32 %v664_v33, %v1037_v22 }
  0xe3   : > { %v749_v23 = vpop.f32.mrf.mxu0 }
  0xe4   : > { %v395_v55 = vadd.f32 %v749_v23, %v664_v33  ;;  %v450_v0 = vmax.f32 %v380_v62, 0.0 }
  0xe5   : > { %v389_v24 = vpop.f32.mrf.mxu0 }
  0xe6   : > { %v453_v57 = vmax.f32 %v395_v55, 0.0  ;;  %v390_v58 = vadd.f32 %v664_v33, %v389_v24 }
  0xe7   : > { %v752_v25 = vpop.f32.mrf.mxu0 }
  0xe8   : > { %v405_v51 = vadd.f32 %v752_v25, %v664_v33  ;;  %v452_v60 = vmax.f32 %v390_v58, 0.0 }
  0xe9   : > { %v399_v26 = vpop.f32.mrf.mxu0 }
  0xea   : > { %v455_v53 = vmax.f32 %v405_v51, 0.0  ;;  %v400_v54 = vadd.f32 %v664_v33, %v399_v26 }
  0xeb   : > { %v755_v27 = vpop.f32.mrf.mxu0 }
  0xec   : > { %v415_v47 = vadd.f32 %v755_v27, %v664_v33  ;;  %v454_v56 = vmax.f32 %v400_v54, 0.0 }
  0xed   : > { %v409_v28 = vpop.f32.mrf.mxu0 }
  0xee   : > { %v457_v49 = vmax.f32 %v415_v47, 0.0  ;;  %v410_v50 = vadd.f32 %v664_v33, %v409_v28 }
  0xef   : > { %v758_v29 = vpop.f32.mrf.mxu0 }
  0xf0   : > { %v425_v43 = vadd.f32 %v758_v29, %v664_v33  ;;  %v456_v52 = vmax.f32 %v410_v50, 0.0 }
  0xf1   : > { %v419_v30 = vpop.f32.mrf.mxu0 }
  0xf2   : > { %v459_v45 = vmax.f32 %v425_v43, 0.0  ;;  %v420_v46 = vadd.f32 %v664_v33, %v419_v30 }
  0xf3   : > { %v761_v31 = vpop.f32.mrf.mxu0 }
  0xf4   : > { %v435_v39 = vadd.f32 %v761_v31, %v664_v33  ;;  %v458_v48 = vmax.f32 %v420_v46, 0.0 }
  0xf5   : > { %v429_v32 = vpop.f32.mrf.mxu0 }
  0xf6   : > { %v461_v41 = vmax.f32 %v435_v39, 0.0  ;;  %v430_v42 = vadd.f32 %v664_v33, %v429_v32 }
  0xf7   : > { %v764_v34 = vpop.f32.mrf.mxu0 }
  0xf8   : > { %v445_v35 = vadd.f32 %v764_v34, %v664_v33  ;;  %v460_v44 = vmax.f32 %v430_v42, 0.0 }
  0xf9   : > { %v439_v36 = vpop.f32.mrf.mxu0 }
  0xfa   : > { %v463_v37 = vmax.f32 %v445_v35, 0.0  ;;  %v440_v38 = vadd.f32 %v664_v33, %v439_v36 }
  0xfc   : > { %766 = vmatpush3.xpose.msk.msra.mxu1 %vm467_vm3, %v463_v37  ;;  %v462_v40 = vmax.f32 %v440_v38, 0.0 }
  0xfd   : > { %767 = vmatprep.subr.mxu1 %v903_v18 }
 0x100   : > { %768 = vmatpush3.xpose.msk.msra.mxu1 %vm467_vm3, %v462_v40 }
 0x101   : > { %769 = vmatprep.subr.mxu1 %v903_v18 }
 0x104   : > { %770 = vmatpush3.xpose.msk.msra.mxu1 %vm467_vm3, %v461_v41 }
 0x105   : > { %771 = vmatprep.subr.mxu1 %v903_v18 }
 0x108   : > { %772 = vmatpush3.xpose.msk.msra.mxu1 %vm467_vm3, %v460_v44 }
 0x109   : > { %773 = vmatprep.subr.mxu1 %v903_v18 }
 0x10c   : > { %774 = vmatpush3.xpose.msk.msra.mxu1 %vm467_vm3, %v459_v45 }
 0x10d   : > { %775 = vmatprep.subr.mxu1 %v903_v18 }
 0x110   : > { %776 = vmatpush3.xpose.msk.msra.mxu1 %vm467_vm3, %v458_v48 }
 0x111   : > { %777 = vmatprep.subr.mxu1 %v903_v18 }
 0x114   : > { %778 = vmatpush3.xpose.msk.msra.mxu1 %vm467_vm3, %v457_v49 }
 0x115   : > { %779 = vmatprep.subr.mxu1 %v903_v18 }
 0x118   : > { %780 = vmatpush3.xpose.msk.msra.mxu1 %vm467_vm3, %v456_v52 }
 0x119   : > { %781 = vmatprep.subr.mxu1 %v903_v18 }
 0x11c   : > { %782 = vmatpush3.xpose.msk.msra.mxu1 %vm467_vm3, %v455_v53 }
 0x11d   : > { %783 = vmatprep.subr.mxu1 %v903_v18 }
 0x120   : > { %784 = vmatpush3.xpose.msk.msra.mxu1 %vm467_vm3, %v454_v56 }
 0x121   : > { %785 = vmatprep.subr.mxu1 %v903_v18 }
 0x124   : > { %786 = vmatpush3.xpose.msk.msra.mxu1 %vm467_vm3, %v453_v57 }
 0x125   : > { %787 = vmatprep.subr.mxu1 %v903_v18 }
 0x128   : > { %788 = vmatpush3.xpose.msk.msra.mxu1 %vm467_vm3, %v452_v60 }
 0x129   : > { %789 = vmatprep.subr.mxu1 %v903_v18 }
 0x12c   : > { %790 = vmatpush3.xpose.msk.msra.mxu1 %vm467_vm3, %v451_v61 }
 0x12d   : > { %791 = vmatprep.subr.mxu1 %v903_v18 }
 0x130   : > { %792 = vmatpush3.xpose.msk.msra.mxu1 %vm467_vm3, %v450_v0 }
 0x131   : > { %793 = vmatprep.subr.mxu1 %v903_v18 }
 0x134   : > { %794 = vmatpush3.xpose.msk.msra.mxu1 %vm467_vm3, %v449_v1 }
 0x135   : > { %795 = vmatprep.subr.mxu1 %v903_v18 }
 0x138   : > { %796 = vmatpush3.xpose.msk.msra.mxu1 %vm467_vm3, %v448_v3 }
 0x13b   : > { %798 = vmatmul.mubr.msk.f32.vlgmr.msra.gmra.mxu1 %vm467_vm3, %v464_v4 }
 0x1fb   : > { %v585_v6 = vpop.f32.mrf.mxu1 }
 0x1fc   : > { %v586_v7 = vadd.f32 %v585_v6, %v466_v5 }
 0x1fd   : > { %v799_v8 = vpop.f32.mrf.mxu1 }
 0x1fe   : > { %589 = vst [vmem:[%s218_s26] sm:$0x1] %v586_v7 }
 0x1ff   : > { %854 = shalt.err (!%p851_p3)
}
 0x200   : > { %s855_s10 = scalar_lea.hbm %s1085_s8, 16  ;;  %s859_s17 = scalar_lea.hbm %s1125_s5, 32 }
 0x201   : > { %p856_p4 = scmp.ne.s32.totalorder %s1085_s8, %s855_s10  ;;  %p860_p9 = scmp.lt.s32.totalorder %s1085_s8, %s1125_s5 }
 0x202   : > { %p861_p10 = scmp.lt.s32.totalorder %s859_s17, %s855_s10 }
 0x203   : > { %p857_p7 = pnand %p856_p4, %p974_p5 }
 0x204   : > { %p862_p11 = por %p861_p10, %p860_p9 }
 0x205   : > { %p858_p8 = pneg %p857_p7 }
 0x207   : > { %p863_p12 = pnand %p862_p11, %p858_p8 }
 0x209   : > { %866 = shalt.err (!%p863_p12)
}
 0x20a   : > { %800 = dma.vmem_to_hbm [thread:$0]  (%p974_p5), %s604_s27, 16, %s1085_s8, %s591_s9  }
 0x20b PF: > { %p806_p13 = scmp.ge.s32.totalorder %s901_s23, 2  ;;  %s615_s4 = sand.u32 1, %s889_s20  }
 0x20c   : > { %s616_s24 = scalar_lea.sflag [#allocation4], %s615_s4 }
 0x20d   : > { %p803_p0 = pnand %p806_p13, %p978_p6 }
 0x20f   : > { %p804_p1 = pneg %p803_p0 }
 0x211   : > { %884 = dma.done.wait (%p804_p1), %s616_s24, 16  }
 0x212   : > { %886 = vsyncadd (%p804_p1), %s616_s24, 4294967280  ;;  %p16_p2 = scmp.ge.s32.totalorder %s962_s25, 4   ;;  %s1128_s20 = smov %s893_s21 }
 0x213   : > { %s1129_s21 = smov %s897_s22  ;;  %s1130_s22 = smov %s972_s28 }
 0x214   : > { %s1131_s23 = smov %s962_s25  ;;  %18 = sbr.rel (!%p16_p2) target bundleno = 5 (0x5), region = 75 }
 0x219   :  { %620 = vsyncpa [#allocation4], 1 }
 0x21a   :  { %622 = vsyncpa [#allocation4 + $0x1], 1 }

</bundles_post_ra>
